<compile_context>
chip_gen: v7x
topology: tpu7x:2x2x1
jax: 0.10.0
libtpu: 0.0.40
codegen_flags: <defaults>
</compile_context>

<pallas_src>
import functools
import math

import numpy as np
import jax
import jax.numpy as jnp
from jax import lax
from jax.experimental import pallas as pl
from jax.experimental.pallas import tpu as pltpu


def _round_up(x, m):
    return ((x + m - 1) // m) * m


def _vmem_capacity_bytes():
    try:
        return int(pltpu.get_tpu_info().vmem_capacity_bytes)
    except Exception:
        return 64 * 1024 * 1024  # conservative (v7x per-TensorCore)


def _extract_blocks_kernel(*refs, R, Sh, Hc, n_cchunks, in_stride, Wc_in, WOc,
                           band_resident, use_gcol, use_grow, rows_first):
    """Grid = (N, n_groups). One step = one batch element x R block-rows.

    refs (in order): x_ref, [gcol_ref], [grow_ref], o_ref
      x_ref   : (1, R*Sh, W_need)  band (Sh == Bh)  or  (1, H_need, W_need) plane
      gcol_ref: (Wc_in, WOc)       one-hot column gather (shared across lane chunks)
      grow_ref: (R*Bh, Hc)         one-hot row gather
      o_ref   : (1, 1, R*Bh, n_cchunks*WOc)  lane-dense output slab
    """
    idx = 0
    x_ref = refs[idx]; idx += 1
    gcol_ref = None
    grow_ref = None
    if use_gcol:
        gcol_ref = refs[idx]; idx += 1
    if use_grow:
        grow_ref = refs[idx]; idx += 1
    o_ref = refs[idx]

    if not band_resident:
        g = pl.program_id(1)
        row0 = pl.multiple_of(g * (R * Sh), 8)   # R*Sh is a multiple of 8

    gcol = gcol_ref[...] if use_gcol else None
    grow = grow_ref[...] if use_grow else None

    for c in range(n_cchunks):                   # static unroll over lane chunks
        c0 = c * in_stride
        if band_resident:
            band_c = x_ref[0, :, c0:c0 + Wc_in]
        else:
            band_c = x_ref[0, pl.ds(row0, Hc), c0:c0 + Wc_in]

        if not use_gcol:
            # Sw == Bw: columns are already in place (Wc_in == WOc).
            piece = band_c
            if use_grow:
                piece = jnp.dot(grow, piece, preferred_element_type=jnp.float32)
        elif use_grow and rows_first:
            # (grow @ band) @ gcol — cheaper when columns shrink / rows dominate.
            piece = jnp.dot(grow, band_c, preferred_element_type=jnp.float32)
            piece = jnp.dot(piece, gcol, preferred_element_type=jnp.float32)
        else:
            # (band @ gcol) [@ grow] — cheaper when columns expand.
            piece = jnp.dot(band_c, gcol, preferred_element_type=jnp.float32)
            if use_grow:
                piece = jnp.dot(grow, piece, preferred_element_type=jnp.float32)

        o_ref[0, 0, :, c * WOc:(c + 1) * WOc] = piece.astype(o_ref.dtype)


def block_forward(x, block_size, block_stride, *, cols_per_chunk=None,
                  lane_dense_output=False, target_m=256,
                  max_gcol_bytes=4 * 1024 * 1024):
    """Pallas equivalent of Block(block_size, block_stride).forward(x) for 2D blocks.

    x: jnp array [..., H, W]  ->  (y, nblocks)
       y: [..., nBh*nBw, Bh, Bw]   (or [..., nBh, Bh, nBw*Bw] if lane_dense_output)
       nblocks: (nBh, nBw)
    """
    assert len(block_size) == 2 and len(block_stride) == 2, "2D path only"
    # TODO(synk): 3D block extraction (F.conv3d path) not implemented.

    if jnp.issubdtype(x.dtype, jnp.complexfloating):
        xs = jnp.stack([jnp.real(x), jnp.imag(x)], axis=0)   # one kernel call for both planes
        y, nblocks = block_forward(xs, block_size, block_stride,
                                   cols_per_chunk=cols_per_chunk,
                                   lane_dense_output=lane_dense_output,
                                   target_m=target_m, max_gcol_bytes=max_gcol_bytes)
        return lax.complex(y[0], y[1]).astype(x.dtype), nblocks

    Bh, Bw = block_size
    Sh, Sw = block_stride
    lead = x.shape[:-2]
    H, W = x.shape[-2:]
    N = int(np.prod(lead)) if len(lead) > 0 else 1
    itemsize = jnp.dtype(x.dtype).itemsize

    nBh = (H - Bh) // Sh + 1                      # padding='valid'
    nBw = (W - Bw) // Sw + 1
    assert nBh > 0 and nBw > 0

    use_grow = (Sh != Bh)                         # row gather needed (overlap / gaps)
    use_gcol = (Sw != Bw)                         # column gather needed (overlap / gaps)

    # ---- lane (column) chunking: block-diagonal column gather -----------------
    if cols_per_chunk is not None:
        nBw_c = max(1, min(int(cols_per_chunk), nBw))
    elif use_gcol and ((nBw - 1) * Sw + Bw) * nBw * Bw * itemsize > max_gcol_bytes:
        base = 128 // math.gcd(Sw, 128)           # 128-lane aligned chunk starts
        nBw_c = min(nBw, base * max(1, -(-512 // (base * Bw))))
    else:
        nBw_c = nBw

    n_cchunks = -(-nBw // nBw_c)
    nBw_pad = n_cchunks * nBw_c
    WOc = nBw_c * Bw
    WO_pad = nBw_pad * Bw
    in_stride = nBw_c * Sw
    Wc_in = (nBw_c - 1) * Sw + Bw if use_gcol else WOc
    W_need = (nBw_pad - 1) * Sw + Bw              # input columns actually read

    # ---- block-rows per grid step (8-aligned window, fills the MXU M dim) -----
    align = 8 // math.gcd(Sh, 8)                  # align*Sh is a multiple of 8
    R = align
    while R * Bh < target_m and R < nBh:
        R += align

    vmem_cap = _vmem_capacity_bytes()
    budget = int(0.75 * vmem_cap)

    def _plan(R):
        n_groups = -(-nBh // R)
        nBh_pad = n_groups * R
        if use_grow:
            Hc = _round_up((R - 1) * Sh + Bh, 8)  # 8-aligned band height
            H_need = (n_groups - 1) * R * Sh + Hc
            band_resident = False
        else:
            Hc = R * Bh                           # == R*Sh, multiple of 8
            H_need = n_groups * R * Sh
            band_resident = True
        # VMEM the pipeline will actually hold (gather mats single-buffered).
        x_bytes = (2 * R * Sh * W_need if band_resident
                   else (1 if N == 1 else 2) * H_need * W_need) * itemsize
        out_bytes = 2 * R * Bh * WO_pad * itemsize
        const_bytes = ((Wc_in * WOc if use_gcol else 0)
                       + (R * Bh * Hc if use_grow else 0)) * itemsize
        work_bytes = (Hc * Wc_in + Hc * WOc + 2 * R * Bh * WOc) * 4
        return dict(n_groups=n_groups, nBh_pad=nBh_pad, Hc=Hc, H_need=H_need,
                    band_resident=band_resident,
                    vmem=x_bytes + out_bytes + const_bytes + work_bytes)

    plan = _plan(R)
    while plan["vmem"] > budget and R > align:
        R -= align
        plan = _plan(R)

    n_groups = plan["n_groups"]
    nBh_pad = plan["nBh_pad"]
    Hc = plan["Hc"]
    H_need = plan["H_need"]
    band_resident = plan["band_resident"]
    vmem_need = plan["vmem"]

    # matmul association (only matters when both gathers are matmuls)
    rows_first = False
    if use_gcol and use_grow:
        flops_cols_first = Hc * Wc_in * WOc + R * Bh * Hc * WOc
        flops_rows_first = R * Bh * Hc * Wc_in + R * Bh * Wc_in * WOc
        rows_first = flops_rows_first < flops_cols_first

    # ---- operands --------------------------------------------------------------
    xf = x.reshape(N, H, W)
    if H_need != H or W_need != W:
        xf = jnp.pad(xf, ((0, 0), (0, max(0, H_need - H)), (0, max(0, W_need - W))))
        xf = xf[:, :H_need, :W_need]

    operands = [xf]
    if use_gcol:
        # One-hot column gather shared by all lane chunks (conv-kernel diagonal, eps=0).
        gcol = np.zeros((Wc_in, WOc), dtype=np.float32)
        for q in range(nBw_c):
            for bw in range(Bw):
                gcol[q * Sw + bw, q * Bw + bw] = 1.0
        operands.append(jnp.asarray(gcol, dtype=x.dtype))
    if use_grow:
        grow = np.zeros((R * Bh, Hc), dtype=np.float32)
        for r in range(R):
            for bh in range(Bh):
                grow[r * Bh + bh, r * Sh + bh] = 1.0
        operands.append(jnp.asarray(grow, dtype=x.dtype))

    kernel = functools.partial(
        _extract_blocks_kernel, R=R, Sh=Sh, Hc=Hc, n_cchunks=n_cchunks,
        in_stride=in_stride, Wc_in=Wc_in, WOc=WOc, band_resident=band_resident,
        use_gcol=use_gcol, use_grow=use_grow, rows_first=rows_first)

    # cost / vmem hints
    if not use_gcol:
        flops_chunk = 2 * R * Bh * Hc * WOc if use_grow else 0
    elif use_grow and rows_first:
        flops_chunk = 2 * (R * Bh * Hc * Wc_in + R * Bh * Wc_in * WOc)
    else:
        flops_chunk = 2 * (Hc * Wc_in * WOc + (R * Bh * Hc * WOc if use_grow else 0))
    flops = N * n_groups * n_cchunks * flops_chunk
    x_read = N * (n_groups * R * Sh if band_resident else H_need) * W_need
    bytes_accessed = (x_read + N * n_groups * R * Bh * WO_pad
                      + (Wc_in * WOc if use_gcol else 0)
                      + (R * Bh * Hc if use_grow else 0)) * itemsize
    vmem_limit = min(max(int(1.5 * vmem_need), 32 * 1024 * 1024),
                     vmem_cap - 4 * 1024 * 1024)

    def _build_specs(allow_single_buffer):
        def spec(shape, index_map, single):
            if single and allow_single_buffer:
                return pl.BlockSpec(shape, index_map, pipeline_mode=pl.Buffered(1))
            return pl.BlockSpec(shape, index_map)

        specs = []
        if band_resident:
            specs.append(spec((1, R * Sh, W_need), lambda n, g: (n, g, 0), single=False))
        else:
            specs.append(spec((1, H_need, W_need), lambda n, g: (n, 0, 0), single=(N == 1)))
        if use_gcol:
            specs.append(spec((Wc_in, WOc), lambda n, g: (0, 0), single=True))
        if use_grow:
            specs.append(spec((R * Bh, Hc), lambda n, g: (0, 0), single=True))
        return specs

    def _run(allow_single_buffer):
        return pl.pallas_call(
            kernel,
            out_shape=jax.ShapeDtypeStruct((N, n_groups, R * Bh, WO_pad), x.dtype),
            grid=(N, n_groups),
            in_specs=_build_specs(allow_single_buffer),
            out_specs=pl.BlockSpec((1, 1, R * Bh, WO_pad), lambda n, g: (n, g, 0, 0)),
            compiler_params=pltpu.CompilerParams(
                dimension_semantics=("parallel", "parallel"),
                vmem_limit_bytes=int(vmem_limit)),
            cost_estimate=pl.CostEstimate(
                flops=int(flops), transcendentals=0, bytes_accessed=int(bytes_accessed)),
        )(*operands)

    try:
        out = _run(True)
    except Exception:
        # pipeline_mode=pl.Buffered(1) unsupported on this jax build: fall back to defaults.
        out = _run(False)

    # (N, n_groups, R*Bh, WO_pad) -> (N, nBh_pad, Bh, nBw_pad, Bw) -> slice padding off
    out = out.reshape(N, nBh_pad, Bh, nBw_pad, Bw)[:, :nBh, :, :nBw, :]
    if lane_dense_output:
        y = out.reshape(*lead, nBh, Bh, nBw * Bw)      # skips the lane-sparse transpose
    else:
        y = out.transpose(0, 1, 3, 2, 4).reshape(*lead, nBh * nBw, Bh, Bw)
    return y, (nBh, nBw)


def _reference_forward_numpy(x, block_size, block_stride):
    """Pure numpy reference of Block.forward (identical to the one-hot conv + unpack)."""
    Bh, Bw = block_size
    Sh, Sw = block_stride
    lead = x.shape[:-2]
    H, W = x.shape[-2:]
    N = int(np.prod(lead)) if len(lead) > 0 else 1
    xf = np.asarray(x).reshape(N, H, W)
    nBh = (H - Bh) // Sh + 1
    nBw = (W - Bw) // Sw + 1
    y = np.zeros((N, nBh * nBw, Bh, Bw), dtype=xf.dtype)
    for n in range(N):
        for p in range(nBh):
            for q in range(nBw):
                y[n, p * nBw + q] = xf[n, p * Sh:p * Sh + Bh, q * Sw:q * Sw + Bw]
    return y.reshape(*lead, nBh * nBw, Bh, Bw), (nBh, nBw)


if __name__ == "__main__":
    key = jax.random.PRNGKey(0)

    def check(x, block_size, block_stride, **kw):
        y, nblocks = block_forward(x, block_size, block_stride, **kw)
        y = jax.block_until_ready(y)
        y_ref, nblocks_ref = _reference_forward_numpy(np.asarray(x), block_size, block_stride)
        assert tuple(int(v) for v in nblocks) == tuple(nblocks_ref), (nblocks, nblocks_ref)
        assert y.shape == y_ref.shape, (y.shape, y_ref.shape)
        np.testing.assert_allclose(np.asarray(y), y_ref, rtol=0, atol=0)

    k1, k2, k3, k4, k5a, k5b = jax.random.split(key, 6)

    # 1) overlapping rows+cols: row+column gather matmuls, single lane chunk
    check(jax.random.normal(k1, (2, 4, 16, 16), jnp.float32), (4, 4), (2, 2))
    # 2) stride == block size: pure-copy fast path (no MXU work, band-resident input)
    check(jax.random.normal(k2, (2, 4, 16, 16), jnp.float32), (4, 4), (4, 4))
    # 3) non-overlapping rows, overlapping cols: band-resident + column gather only
    check(jax.random.normal(k3, (2, 4, 16, 16), jnp.float32), (4, 4), (4, 2))
    # 4) forced multi-chunk lane tiling (block-diagonal column gather + row/col padding)
    check(jax.random.normal(k4, (1, 16, 24), jnp.float32), (4, 4), (2, 2), cols_per_chunk=4)
    # 5) column gaps (stride > block) -> cols-first association; complex-input path
    xc = (jax.random.normal(k5a, (2, 16, 16), jnp.float32)
          + 1j * jax.random.normal(k5b, (2, 16, 16), jnp.float32)).astype(jnp.complex64)
    check(xc, (4, 2), (2, 4))

    print("KERNEL_OK")
</pallas_src>

<mosaic_0001>
module attributes {stable_mosaic.version = 11 : i64} {
  func.func @_extract_blocks_kernel(%arg0: i32, %arg1: i32, %arg2: memref<1x24x16xf32, #tpu.memory_space<vmem>>, %arg3: memref<16x28xf32, #tpu.memory_space<vmem>>, %arg4: memref<32x24xf32, #tpu.memory_space<vmem>>, %arg5: memref<1x1x32x28xf32, #tpu.memory_space<vmem>>) attributes {dimension_semantics = [#tpu.dimension_semantics<parallel>, #tpu.dimension_semantics<parallel>], iteration_bounds = array<i64: 8, 1>, scalar_prefetch = 0 : i64, scratch_operands = 0 : i64, tpu.core_type = #tpu.core_type<tc>, window_params = [{transform_indices = @transform_0, window_bounds = array<i64: 1, 24, 16>}, {pipeline_mode = #tpu.pipeline_mode<synchronous>, transform_indices = @transform_1, window_bounds = array<i64: 16, 28>}, {pipeline_mode = #tpu.pipeline_mode<synchronous>, transform_indices = @transform_2, window_bounds = array<i64: 32, 24>}, {transform_indices = @transform_3, window_bounds = array<i64: 1, 1, 32, 28>}]} {
    %c16_i32 = arith.constant 16 : i32
    %0 = arith.muli %arg1, %c16_i32 : i32
    %1 = tpu.assume_multiple %0, 8 : i32
    %c0 = arith.constant 0 : index
    %c0_0 = arith.constant 0 : index
    %2 = vector.load %arg3[%c0, %c0_0] : memref<16x28xf32, #tpu.memory_space<vmem>>, vector<16x28xf32>
    %c0_1 = arith.constant 0 : index
    %c0_2 = arith.constant 0 : index
    %3 = vector.load %arg4[%c0_1, %c0_2] : memref<32x24xf32, #tpu.memory_space<vmem>>, vector<32x24xf32>
    %c0_3 = arith.constant 0 : index
    %4 = arith.index_cast %1 : i32 to index
    %c0_4 = arith.constant 0 : index
    %5 = vector.load %arg2[%c0_3, %4, %c0_4] : memref<1x24x16xf32, #tpu.memory_space<vmem>>, vector<1x24x16xf32>
    %6 = vector.shape_cast %5 : vector<1x24x16xf32> to vector<24x16xf32>
    %cst = arith.constant dense<0.000000e+00> : vector<32x16xf32>
    %7 = tpu.matmul %3, %6, %cst {dimension_numbers = #tpu.dot_dimension_numbers<[1], [0], [0], [1], [0, 0, 1, 1], [], []>} : vector<32x24xf32>, vector<24x16xf32>, vector<32x16xf32> -> vector<32x16xf32>
    %cst_5 = arith.constant dense<0.000000e+00> : vector<32x28xf32>
    %8 = tpu.matmul %7, %2, %cst_5 {dimension_numbers = #tpu.dot_dimension_numbers<[1], [0], [0], [1], [0, 0, 1, 1], [], []>} : vector<32x16xf32>, vector<16x28xf32>, vector<32x28xf32> -> vector<32x28xf32>
    %c0_6 = arith.constant 0 : index
    %c0_7 = arith.constant 0 : index
    %c0_8 = arith.constant 0 : index
    %c0_9 = arith.constant 0 : index
    %9 = vector.load %arg5[%c0_6, %c0_7, %c0_8, %c0_9] : memref<1x1x32x28xf32, #tpu.memory_space<vmem>>, vector<1x1x32x28xf32>
    %10 = vector.shape_cast %9 : vector<1x1x32x28xf32> to vector<32x28xf32>
    %11 = vector.shape_cast %8 : vector<32x28xf32> to vector<1x1x32x28xf32>
    tpu.vector_store %arg5[%c0_6, %c0_7, %c0_8, %c0_9], %11 {strides = array<i32>} : memref<1x1x32x28xf32, #tpu.memory_space<vmem>>, vector<1x1x32x28xf32>,
    return
  }
  func.func @transform_0(%arg0: i32, %arg1: i32) -> (i32, i32, i32) {
    %c0_i32 = arith.constant 0 : i32
    %c0_i32_0 = arith.constant 0 : i32
    %c0_i32_1 = arith.constant 0 : i32
    return %arg0, %c0_i32, %c0_i32_0 : i32, i32, i32
  }
  func.func @transform_1(%arg0: i32, %arg1: i32) -> (i32, i32) {
    %c0_i32 = arith.constant 0 : i32
    %c0_i32_0 = arith.constant 0 : i32
    %c0_i32_1 = arith.constant 0 : i32
    return %c0_i32, %c0_i32_0 : i32, i32
  }
  func.func @transform_2(%arg0: i32, %arg1: i32) -> (i32, i32) {
    %c0_i32 = arith.constant 0 : i32
    %c0_i32_0 = arith.constant 0 : i32
    %c0_i32_1 = arith.constant 0 : i32
    return %c0_i32, %c0_i32_0 : i32, i32
  }
  func.func @transform_3(%arg0: i32, %arg1: i32) -> (i32, i32, i32, i32) {
    %c0_i32 = arith.constant 0 : i32
    %c0_i32_0 = arith.constant 0 : i32
    %c0_i32_1 = arith.constant 0 : i32
    return %arg0, %arg1, %c0_i32, %c0_i32_0 : i32, i32, i32, i32
  }
}

module attributes {stable_mosaic.version = 11 : i64} {
  func.func @_extract_blocks_kernel(%arg0: i32, %arg1: i32, %arg2: memref<1x24x16xf32, #tpu.memory_space<vmem>>, %arg3: memref<16x28xf32, #tpu.memory_space<vmem>>, %arg4: memref<32x24xf32, #tpu.memory_space<vmem>>, %arg5: memref<1x1x32x28xf32, #tpu.memory_space<vmem>>) attributes {dimension_semantics = [#tpu.dimension_semantics<parallel>, #tpu.dimension_semantics<parallel>], iteration_bounds = array<i64: 8, 1>, scalar_prefetch = 0 : i64, scratch_operands = 0 : i64, tpu.core_type = #tpu.core_type<tc>, window_params = [{transform_indices = @transform_0, window_bounds = array<i64: 1, 24, 16>}, {pipeline_mode = #tpu.pipeline_mode<synchronous>, transform_indices = @transform_1, window_bounds = array<i64: 16, 28>}, {pipeline_mode = #tpu.pipeline_mode<synchronous>, transform_indices = @transform_2, window_bounds = array<i64: 32, 24>}, {transform_indices = @transform_3, window_bounds = array<i64: 1, 1, 32, 28>}]} {
    %c16_i32 = arith.constant 16 : i32
    %0 = arith.muli %arg1, %c16_i32 : i32
    %1 = tpu.assume_multiple %0, 8 : i32
    %c0 = arith.constant 0 : index
    %c0_0 = arith.constant 0 : index
    %2 = vector.load %arg3[%c0, %c0_0] : memref<16x28xf32, #tpu.memory_space<vmem>>, vector<16x28xf32>
    %c0_1 = arith.constant 0 : index
    %c0_2 = arith.constant 0 : index
    %3 = vector.load %arg4[%c0_1, %c0_2] : memref<32x24xf32, #tpu.memory_space<vmem>>, vector<32x24xf32>
    %c0_3 = arith.constant 0 : index
    %4 = arith.index_cast %1 : i32 to index
    %c0_4 = arith.constant 0 : index
    %5 = vector.load %arg2[%c0_3, %4, %c0_4] : memref<1x24x16xf32, #tpu.memory_space<vmem>>, vector<1x24x16xf32>
    %6 = vector.shape_cast %5 : vector<1x24x16xf32> to vector<24x16xf32>
    %cst = arith.constant dense<0.000000e+00> : vector<32x16xf32>
    %7 = tpu.matmul %3, %6, %cst {dimension_numbers = #tpu.dot_dimension_numbers<[1], [0], [0], [1], [0, 0, 1, 1], [], []>} : vector<32x24xf32>, vector<24x16xf32>, vector<32x16xf32> -> vector<32x16xf32>
    %cst_5 = arith.constant dense<0.000000e+00> : vector<32x28xf32>
    %8 = tpu.matmul %7, %2, %cst_5 {dimension_numbers = #tpu.dot_dimension_numbers<[1], [0], [0], [1], [0, 0, 1, 1], [], []>} : vector<32x16xf32>, vector<16x28xf32>, vector<32x28xf32> -> vector<32x28xf32>
    %c0_6 = arith.constant 0 : index
    %c0_7 = arith.constant 0 : index
    %c0_8 = arith.constant 0 : index
    %c0_9 = arith.constant 0 : index
    %9 = vector.load %arg5[%c0_6, %c0_7, %c0_8, %c0_9] : memref<1x1x32x28xf32, #tpu.memory_space<vmem>>, vector<1x1x32x28xf32>
    %10 = vector.shape_cast %9 : vector<1x1x32x28xf32> to vector<32x28xf32>
    %11 = vector.shape_cast %8 : vector<32x28xf32> to vector<1x1x32x28xf32>
    tpu.vector_store %arg5[%c0_6, %c0_7, %c0_8, %c0_9], %11 {strides = array<i32>} : memref<1x1x32x28xf32, #tpu.memory_space<vmem>>, vector<1x1x32x28xf32>,
    return
  }
  func.func @transform_0(%arg0: i32, %arg1: i32) -> (i32, i32, i32) {
    %c0_i32 = arith.constant 0 : i32
    %c0_i32_0 = arith.constant 0 : i32
    %c0_i32_1 = arith.constant 0 : i32
    return %arg0, %c0_i32, %c0_i32_0 : i32, i32, i32
  }
  func.func @transform_1(%arg0: i32, %arg1: i32) -> (i32, i32) {
    %c0_i32 = arith.constant 0 : i32
    %c0_i32_0 = arith.constant 0 : i32
    %c0_i32_1 = arith.constant 0 : i32
    return %c0_i32, %c0_i32_0 : i32, i32
  }
  func.func @transform_2(%arg0: i32, %arg1: i32) -> (i32, i32) {
    %c0_i32 = arith.constant 0 : i32
    %c0_i32_0 = arith.constant 0 : i32
    %c0_i32_1 = arith.constant 0 : i32
    return %c0_i32, %c0_i32_0 : i32, i32
  }
  func.func @transform_3(%arg0: i32, %arg1: i32) -> (i32, i32, i32, i32) {
    %c0_i32 = arith.constant 0 : i32
    %c0_i32_0 = arith.constant 0 : i32
    %c0_i32_1 = arith.constant 0 : i32
    return %arg0, %arg1, %c0_i32, %c0_i32_0 : i32, i32, i32, i32
  }
}

</mosaic_0001>

<bundles_post_ra>
// kernel: tpu_custom_call.1
= control target key start
LH: loop header
LB: loop body
LE: loop exit
PB: predicated region body
PF: predicated region fallthrough
CT: control target
= control target key end

     0   :  { %s621_s12 = smov 0   ;;  %s623_s13 = smov 0   ;;  %s680_s0 = inlined_call_operand.vmem [shape: f32[8,24,16], index: 0, kind: input, shape index: {}]   ;;  %s681_s1 = inlined_call_operand.vmem [shape: f32[16,28], index: 1, kind: input, shape index: {}]   ;;  %s682_s2 = inlined_call_operand.vmem [shape: f32[32,24], index: 2, kind: input, shape index: {}]   ;;  %s683_s3 = inlined_call_operand.vmem [shape: f32[8,1,32,28], index: 3, kind: output, shape index: {}]  }
   0x1   :  { %s625_s14 = smov 0  }
   0x2 LB: > { %s25_s15 = sadd.s32 1, %s595_s13  ;;  %p494_p0 = scmp.ge.s32.totalorder %s599_s14, 1  ;;  %s599_s14 = sphi %s625_s14, %s13_s14   ;;  %s595_s13 = sphi %s623_s13, %s685_s13   ;;  %s591_s12 = sphi %s621_s12, %s684_s12  }
   0x3   : > { %p27_p1 = scmp.ge.s32.totalorder %s25_s15, 8  ;;  %p151_p2 = scmp.lt.s32.totalorder %s599_s14, 9 }
   0x5   : > { %s687_s15 = smov (%p27_p1, %s25_s15), 0  ;;  %p152_p3 = pnand %p494_p0, %p151_p2 }
   0x6   : > { %p179_p4 = scmp.lt.s32.totalorder (!%p152_p3), %s591_s12, 7  ;;  %v196_v0 = vld [vmem:[%s682_s2] sm:$0xff] (!%p152_p3)  ;;  %vm204_vm0 = vcmask (!%p152_p3), 195584   ;;  %v195_v2 = vld [vmem:[%s681_s1 + $0x8] sm:$0xff] (!%p152_p3)  ;;  %v198_v9 = vld [vmem:[%s682_s2 + $0x10] sm:$0xff] (!%p152_p3)  ;;  %vm302_vm1 = vcmask (!%p152_p3), 130048  }
   0x7   : > { %155 = sbr.rel (%p152_p3) target bundleno = 459 (0x1cb), region = 32  ;;  %528 = vmatprep.mubr.msk.f32.mxu0 (!%p152_p3), %vm204_vm0, %v196_v0  ;;  %v194_v1 = vld [vmem:[%s681_s1] sm:$0xff] (!%p152_p3)  ;;  %v197_v8 = vld [vmem:[%s682_s2 + $0x8] sm:$0xff] (!%p152_p3)  ;;  %v199_v10 = vld [vmem:[%s682_s2 + $0x18] sm:$0xff] (!%p152_p3)  ;;  %vm400_vm2 = vcmask (!%p152_p3), 228352  }
   0x8   : > { %v548_v3 = vpack.c.bf16 (!%p152_p3), %v195_v2, %v194_v1 }
   0xa   : > { %549 = vmatprep.subr.bf16.mxu1 (!%p152_p3), %v548_v3 }
   0xb   : > { %551 = vmatpush3.bf16.msra.mxu1 (!%p152_p3), %v548_v3 }
   0xe   : > { %s689_s12 = smov (!%p179_p4, %s591_s12), 7 }
   0xf   : > { %s552_s22 = smul.u32 24, %s689_s12  ;;  %s508_s5 = sshll.u32 %s689_s12, 5 }
  0x10   : > { %s192_s8 = scalar_lea.vmem %s683_s3, %s508_s5 }
  0x11   : > { %s183_s25 = scalar_lea.vmem %s680_s0, %s552_s22 }
  0x12   : > { %v201_v4 = vld [vmem:[%s183_s25] sm:$0xff]  ;;  %v202_v5 = vld [vmem:[%s183_s25 + $0x8] sm:$0xff]  ;;  %v203_v7 = vld [vmem:[%s183_s25 + $0x10] sm:$0xff] }
  0x13   : > { %v544_v6 = vpack.c.bf16 %v202_v5, %v201_v4 }
  0x15   : > { %545 = vmatprep.subr.bf16.mxu0 %v544_v6 }
  0x16   : > { %547 = vmatpush3.bf16.msra.mxu0 %v544_v6 }
  0x17   : > { %526 = vmatprep.subr.mxu0 %v203_v7 }
  0x1a   : > { %527 = vmatpush3.msra.mxu0 %v203_v7 }
  0x1b   : > { %529 = vmatmul.mubr.msk.f32.vlgmr.msra.gmra.mrb[0].mxu0 %vm204_vm0, %v197_v8 }
  0x1c   : > { %531 = vmatprep.mubr.msk.f32.mxu0 %vm204_vm0, %v198_v9 }
  0x1f   : > { %532 = vmatmul.mubr.msk.f32.gmra.mrb[2].mxu0 %vm204_vm0, %v199_v10 }
  0xee   : > { %v530_v11 = vpop.f32.mrb[0].mxu0 }
  0xef   : > { %v283_v12 = vpop.f32.mrb[1].mxu0 }
  0xf0   : > { %538 = vmatprep.mubr.msk.f32.mxu1 %vm302_vm1, %v283_v12 }
  0xf1   : > { %539 = vmatmul.mubr.msk.f32.vlgmr.msra.gmra.mrb[0].mxu1 %vm302_vm1, %v530_v11 }
  0xf2   : > { %v533_v13 = vpop.f32.mrb[2].mxu0 }
  0xf3   : > { %v293_v14 = vpop.f32.mrb[3].mxu0 }
  0xf4   : > { %541 = vmatprep.mubr.msk.f32.mxu1 %vm302_vm1, %v293_v14 }
  0xf5   : > { %542 = vmatmul.mubr.msk.f32.gmra.mrb[2].mxu1 %vm302_vm1, %v533_v13 }
 0x1c4   : > { %v540_v15 = vpop.f32.mrb[0].mxu1 }
 0x1c5   : > { %402 = vst.msk [vmem:[%s192_s8 + $0x8] sm:$0xff] %vm400_vm2, %v540_v15  ;;  %v381_v16 = vpop.f32.mrb[1].mxu1 }
 0x1c6   : > { %401 = vst.msk [vmem:[%s192_s8] sm:$0xff] %vm400_vm2, %v381_v16 }
 0x1c8   : > { %v543_v17 = vpop.f32.mrb[2].mxu1 }
 0x1c9   : > { %404 = vst.msk [vmem:[%s192_s8 + $0x18] sm:$0xff] %vm400_vm2, %v543_v17  ;;  %v391_v18 = vpop.f32.mrb[3].mxu1 }
 0x1ca   : > { %403 = vst.msk [vmem:[%s192_s8 + $0x10] sm:$0xff] %vm400_vm2, %v391_v18 }
 0x1cb PF: > { %s13_s14 = sadd.s32 1, %s599_s14   ;;  %s684_s12 = smov %s595_s13 }
 0x1cc   : > { %p10_p5 = scmp.ge.s32.totalorder %s13_s14, 10   ;;  %s685_s13 = smov %s687_s15 }
 0x1ce   :  { %12 = sbr.rel (!%p10_p5) target bundleno = 2 (0x2), region = 63 }

// kernel: tpu_custom_call.1
= control target key start
LH: loop header
LB: loop body
LE: loop exit
PB: predicated region body
PF: predicated region fallthrough
CT: control target
= control target key end

     0   :  { %s621_s12 = smov 0   ;;  %s623_s13 = smov 0   ;;  %s680_s0 = inlined_call_operand.vmem [shape: f32[8,24,16], index: 0, kind: input, shape index: {}]   ;;  %s681_s1 = inlined_call_operand.vmem [shape: f32[16,28], index: 1, kind: input, shape index: {}]   ;;  %s682_s2 = inlined_call_operand.vmem [shape: f32[32,24], index: 2, kind: input, shape index: {}]   ;;  %s683_s3 = inlined_call_operand.vmem [shape: f32[8,1,32,28], index: 3, kind: output, shape index: {}]  }
   0x1   :  { %s625_s14 = smov 0  }
   0x2 LB: > { %s25_s15 = sadd.s32 1, %s595_s13  ;;  %p494_p0 = scmp.ge.s32.totalorder %s599_s14, 1  ;;  %s599_s14 = sphi %s625_s14, %s13_s14   ;;  %s595_s13 = sphi %s623_s13, %s685_s13   ;;  %s591_s12 = sphi %s621_s12, %s684_s12  }
   0x3   : > { %p27_p1 = scmp.ge.s32.totalorder %s25_s15, 8  ;;  %p151_p2 = scmp.lt.s32.totalorder %s599_s14, 9 }
   0x5   : > { %s687_s15 = smov (%p27_p1, %s25_s15), 0  ;;  %p152_p3 = pnand %p494_p0, %p151_p2 }
   0x6   : > { %p179_p4 = scmp.lt.s32.totalorder (!%p152_p3), %s591_s12, 7  ;;  %v196_v0 = vld [vmem:[%s682_s2] sm:$0xff] (!%p152_p3)  ;;  %vm204_vm0 = vcmask (!%p152_p3), 195584   ;;  %v195_v2 = vld [vmem:[%s681_s1 + $0x8] sm:$0xff] (!%p152_p3)  ;;  %v198_v9 = vld [vmem:[%s682_s2 + $0x10] sm:$0xff] (!%p152_p3)  ;;  %vm302_vm1 = vcmask (!%p152_p3), 130048  }
   0x7   : > { %155 = sbr.rel (%p152_p3) target bundleno = 459 (0x1cb), region = 32  ;;  %528 = vmatprep.mubr.msk.f32.mxu0 (!%p152_p3), %vm204_vm0, %v196_v0  ;;  %v194_v1 = vld [vmem:[%s681_s1] sm:$0xff] (!%p152_p3)  ;;  %v197_v8 = vld [vmem:[%s682_s2 + $0x8] sm:$0xff] (!%p152_p3)  ;;  %v199_v10 = vld [vmem:[%s682_s2 + $0x18] sm:$0xff] (!%p152_p3)  ;;  %vm400_vm2 = vcmask (!%p152_p3), 228352  }
   0x8   : > { %v548_v3 = vpack.c.bf16 (!%p152_p3), %v195_v2, %v194_v1 }
   0xa   : > { %549 = vmatprep.subr.bf16.mxu1 (!%p152_p3), %v548_v3 }
   0xb   : > { %551 = vmatpush3.bf16.msra.mxu1 (!%p152_p3), %v548_v3 }
   0xe   : > { %s689_s12 = smov (!%p179_p4, %s591_s12), 7 }
   0xf   : > { %s552_s22 = smul.u32 24, %s689_s12  ;;  %s508_s5 = sshll.u32 %s689_s12, 5 }
  0x10   : > { %s192_s8 = scalar_lea.vmem %s683_s3, %s508_s5 }
  0x11   : > { %s183_s25 = scalar_lea.vmem %s680_s0, %s552_s22 }
  0x12   : > { %v201_v4 = vld [vmem:[%s183_s25] sm:$0xff]  ;;  %v202_v5 = vld [vmem:[%s183_s25 + $0x8] sm:$0xff]  ;;  %v203_v7 = vld [vmem:[%s183_s25 + $0x10] sm:$0xff] }
  0x13   : > { %v544_v6 = vpack.c.bf16 %v202_v5, %v201_v4 }
  0x15   : > { %545 = vmatprep.subr.bf16.mxu0 %v544_v6 }
  0x16   : > { %547 = vmatpush3.bf16.msra.mxu0 %v544_v6 }
  0x17   : > { %526 = vmatprep.subr.mxu0 %v203_v7 }
  0x1a   : > { %527 = vmatpush3.msra.mxu0 %v203_v7 }
  0x1b   : > { %529 = vmatmul.mubr.msk.f32.vlgmr.msra.gmra.mrb[0].mxu0 %vm204_vm0, %v197_v8 }
  0x1c   : > { %531 = vmatprep.mubr.msk.f32.mxu0 %vm204_vm0, %v198_v9 }
  0x1f   : > { %532 = vmatmul.mubr.msk.f32.gmra.mrb[2].mxu0 %vm204_vm0, %v199_v10 }
  0xee   : > { %v530_v11 = vpop.f32.mrb[0].mxu0 }
  0xef   : > { %v283_v12 = vpop.f32.mrb[1].mxu0 }
  0xf0   : > { %538 = vmatprep.mubr.msk.f32.mxu1 %vm302_vm1, %v283_v12 }
  0xf1   : > { %539 = vmatmul.mubr.msk.f32.vlgmr.msra.gmra.mrb[0].mxu1 %vm302_vm1, %v530_v11 }
  0xf2   : > { %v533_v13 = vpop.f32.mrb[2].mxu0 }
  0xf3   : > { %v293_v14 = vpop.f32.mrb[3].mxu0 }
  0xf4   : > { %541 = vmatprep.mubr.msk.f32.mxu1 %vm302_vm1, %v293_v14 }
  0xf5   : > { %542 = vmatmul.mubr.msk.f32.gmra.mrb[2].mxu1 %vm302_vm1, %v533_v13 }
 0x1c4   : > { %v540_v15 = vpop.f32.mrb[0].mxu1 }
 0x1c5   : > { %402 = vst.msk [vmem:[%s192_s8 + $0x8] sm:$0xff] %vm400_vm2, %v540_v15  ;;  %v381_v16 = vpop.f32.mrb[1].mxu1 }
 0x1c6   : > { %401 = vst.msk [vmem:[%s192_s8] sm:$0xff] %vm400_vm2, %v381_v16 }
 0x1c8   : > { %v543_v17 = vpop.f32.mrb[2].mxu1 }
 0x1c9   : > { %404 = vst.msk [vmem:[%s192_s8 + $0x18] sm:$0xff] %vm400_vm2, %v543_v17  ;;  %v391_v18 = vpop.f32.mrb[3].mxu1 }
 0x1ca   : > { %403 = vst.msk [vmem:[%s192_s8 + $0x10] sm:$0xff] %vm400_vm2, %v391_v18 }
 0x1cb PF: > { %s13_s14 = sadd.s32 1, %s599_s14   ;;  %s684_s12 = smov %s595_s13 }
 0x1cc   : > { %p10_p5 = scmp.ge.s32.totalorder %s13_s14, 10   ;;  %s685_s13 = smov %s687_s15 }
 0x1ce   :  { %12 = sbr.rel (!%p10_p5) target bundleno = 2 (0x2), region = 63 }

</bundles_post_ra>
